<compile_context>
chip_gen: v6e
topology: v6e:2x2x1
jax: 0.10.0
libtpu: 0.0.40
codegen_flags: <defaults>
</compile_context>

<pallas_src>
import functools

import jax
import jax.numpy as jnp
from jax.experimental import pallas as pl
from jax.experimental.pallas import tpu as pltpu


# ----------------------------- config -----------------------------------
INPUT_DIM = 16    # input_dim
HIDDEN_DIM = 32   # hidden_dim
N_LAYERS = 2      # n_layers (layer 1 is dead w.r.t. the output; see header)
BATCH = 8
SEQ = 8


# ----------------------------- kernel -----------------------------------
def lstm_fc_kernel(x_ref,       # (T*B, D)   time-major, flattened
                   slab_ref,    # (56, 4H)   packed: wih0|whh0|b0|fc_w|fc_b
                   out_ref,     # (B, 1)
                   *, seq_len, batch, hidden_dim, input_dim):
    T, B, H, D = seq_len, batch, hidden_dim, input_dim

    # ---- unpack the weight slab once (static slices, outside the loop) ----
    wih0 = slab_ref[0:D, :]                     # (D, 4H)  i/f/o cols pre-scaled by 0.5
    whh0 = slab_ref[D:D + H, :]                 # (H, 4H)  i/f/o cols pre-scaled by 0.5
    tail = slab_ref[D + H:D + H + 8, :]         # aligned (8, 4H) tail block
    b0 = tail[0:1, :]                           # (1, 4H)  b_ih + b_hh, i/f/o pre-scaled
    wfc = tail[1:2, 0:H]                        # (1, H)   fc weight (row layout)
    bfc = tail[2:3, 0:1]                        # (1, 1)   fc bias

    # ---- hoisted layer-0 input projection, batched over all time steps ----
    # (T*B, D) @ (D, 4H) + bias -> (T*B, 4H); off the serial critical path.
    xg = jnp.dot(x_ref[...], wih0, preferred_element_type=jnp.float32) + b0

    # ---- state carried in vregs (no VMEM scratch round-trips) ----
    h0 = jnp.zeros((B, H), jnp.float32)
    c0 = jnp.zeros((B, H), jnp.float32)

    # Fully unrolled time recurrence (T static & small): full LLO scheduling
    # visibility across the whole chain.  Per step: one (B,2H-ish) MXU push,
    # one full-width EUP tanh, one small EUP tanh, a handful of VPU FMAs.
    for t in range(T):
        gates = xg[t * B:(t + 1) * B, :] + jnp.dot(
            h0, whh0, preferred_element_type=jnp.float32)        # (B, 4H)
        th = jnp.tanh(gates)                                      # one EUP pass
        # sigmoid(z) == 0.5*(tanh(z/2)+1); the /2 was folded into the weights.
        i_g = 0.5 * (th[:, 0 * H:1 * H] + 1.0)
        f_g = 0.5 * (th[:, 1 * H:2 * H] + 1.0)
        g_g = th[:, 2 * H:3 * H]
        o_g = 0.5 * (th[:, 3 * H:4 * H] + 1.0)
        c0 = f_g * c0 + i_g * g_g
        h0 = o_g * jnp.tanh(c0)

    # dropout(p=0.4) is identity in eval mode; fc(hn[0]) as a lane reduction
    # (avoids an N=1 MXU pass at the tail of the serial chain).
    out_ref[...] = jnp.sum(h0 * wfc, axis=1, keepdims=True) + bfc


def lstm_model_forward(x_btd, params):
    """x_btd: (B, T, D) float32, like the PyTorch batch_first input."""
    B, T, D = x_btd.shape
    H = HIDDEN_DIM

    (wih0, whh0, b0, wih1, whh1, b1, wfc, bfc) = params
    del wih1, whh1, b1   # layer 1 is dead w.r.t. the output (fc consumes hn[0])

    # sigmoid-as-tanh column scaling: 0.5 on i/f/o gate columns, 1.0 on g.
    col_scale = jnp.concatenate([
        jnp.full((H,), 0.5, jnp.float32),
        jnp.full((H,), 0.5, jnp.float32),
        jnp.ones((H,), jnp.float32),
        jnp.full((H,), 0.5, jnp.float32)])                        # (4H,)
    wih0_s = wih0 * col_scale[None, :]
    whh0_s = whh0 * col_scale[None, :]
    b0_s = b0 * col_scale[None, :]

    # Pack all layer-0 + fc parameters into one lane-dense (56, 4H) slab:
    #   rows [0, D)       : wih0 (scaled)
    #   rows [D, D+H)     : whh0 (scaled)
    #   row  D+H          : combined bias (scaled)
    #   row  D+H+1        : fc weight in lanes [0, H)
    #   row  D+H+2        : fc bias in lane 0
    #   rows up to 56     : zero padding (sublane alignment)
    fc_w_row = jnp.zeros((1, 4 * H), jnp.float32).at[0, :H].set(wfc[:, 0])
    fc_b_row = jnp.zeros((1, 4 * H), jnp.float32).at[0, 0].set(bfc[0, 0])
    n_rows = D + H + 3
    pad_rows = (-n_rows) % 8
    slab = jnp.concatenate(
        [wih0_s, whh0_s, b0_s, fc_w_row, fc_b_row,
         jnp.zeros((pad_rows, 4 * H), jnp.float32)], axis=0)       # (56, 4H)

    # time-major, flattened to (T*B, D): in-kernel input projection is one
    # well-shaped (M=T*B) matmul and per-step slices are sublane-aligned.
    x_flat = jnp.transpose(x_btd, (1, 0, 2)).reshape(T * B, D)

    kernel = functools.partial(lstm_fc_kernel,
                               seq_len=T, batch=B, hidden_dim=H, input_dim=D)

    vmem_spec = pl.BlockSpec(memory_space=pltpu.MemorySpace.VMEM)

    out = pl.pallas_call(
        kernel,
        out_shape=jax.ShapeDtypeStruct((B, 1), jnp.float32),
        in_specs=[vmem_spec, vmem_spec],     # 2 operands -> 2 DMAs, no grid,
        out_specs=vmem_spec,                 # no double-buffer allocation
    )(x_flat, slab)
    return out


# ------------------------ pure-JAX reference -----------------------------
def lstm_model_reference(x_btd, params):
    """Faithful 2-layer LSTM + fc(hn[0]) reference (matches the PyTorch module)."""
    (wih0, whh0, b0, wih1, whh1, b1, wfc, bfc) = params
    B, T, D = x_btd.shape
    H = HIDDEN_DIM
    h = jnp.zeros((N_LAYERS, B, H), jnp.float32)
    c = jnp.zeros((N_LAYERS, B, H), jnp.float32)

    def cell(inp, h_prev, c_prev, w_ih, w_hh, b):
        gates = inp @ w_ih + h_prev @ w_hh + b
        i_g = jax.nn.sigmoid(gates[:, 0 * H:1 * H])
        f_g = jax.nn.sigmoid(gates[:, 1 * H:2 * H])
        g_g = jnp.tanh(gates[:, 2 * H:3 * H])
        o_g = jax.nn.sigmoid(gates[:, 3 * H:4 * H])
        c_new = f_g * c_prev + i_g * g_g
        h_new = o_g * jnp.tanh(c_new)
        return h_new, c_new

    for t in range(T):
        x_t = x_btd[:, t, :]
        h0, c0 = cell(x_t, h[0], c[0], wih0, whh0, b0)
        h1, c1 = cell(h0, h[1], c[1], wih1, whh1, b1)
        h = jnp.stack([h0, h1])
        c = jnp.stack([c0, c1])
    # fc(dropout(hn[0])) with dropout = identity (eval mode)
    return h[0] @ wfc + bfc


# ----------------------------- params ------------------------------------
def init_params(key):
    """Deterministic init matching PyTorch LSTM param shapes (transposed for x@W)."""
    D, H = INPUT_DIM, HIDDEN_DIM
    bound = 1.0 / jnp.sqrt(jnp.float32(H))
    ks = jax.random.split(key, 9)
    u = lambda k, shape: jax.random.uniform(k, shape, jnp.float32, -bound, bound)
    wih0 = u(ks[0], (D, 4 * H))
    whh0 = u(ks[1], (H, 4 * H))
    b0 = u(ks[2], (1, 4 * H)) + u(ks[3], (1, 4 * H))   # b_ih + b_hh combined
    wih1 = u(ks[4], (H, 4 * H))
    whh1 = u(ks[5], (H, 4 * H))
    b1 = u(ks[6], (1, 4 * H)) + u(ks[7], (1, 4 * H))
    kfc1, kfc2 = jax.random.split(ks[8])
    fc_bound = 1.0 / jnp.sqrt(jnp.float32(H))
    wfc = jax.random.uniform(kfc1, (H, 1), jnp.float32, -fc_bound, fc_bound)
    bfc = jax.random.uniform(kfc2, (1, 1), jnp.float32, -fc_bound, fc_bound)
    return (wih0, whh0, b0, wih1, whh1, b1, wfc, bfc)


if __name__ == "__main__":
    key = jax.random.PRNGKey(0)
    k_x, k_p = jax.random.split(key)
    x = jax.random.normal(k_x, (BATCH, SEQ, INPUT_DIM), jnp.float32)
    params = init_params(k_p)

    out = lstm_model_forward(x, params)
    out = jax.block_until_ready(out)

    ref = lstm_model_reference(x, params)
    assert out.shape == (BATCH, 1)
    assert jnp.allclose(out, ref, atol=1e-5, rtol=1e-5), (out, ref)
    print("KERNEL_OK")
</pallas_src>

<mosaic_0001>
module attributes {stable_mosaic.version = 11 : i64} {
  func.func @lstm_fc_kernel(%arg0: memref<64x16xf32, #tpu.memory_space<vmem>>, %arg1: memref<56x128xf32, #tpu.memory_space<vmem>>, %arg2: memref<8x1xf32, #tpu.memory_space<vmem>>) attributes {dimension_semantics = [], scalar_prefetch = 0 : i64, scratch_operands = 0 : i64, tpu.core_type = #tpu.core_type<tc>} {
    %c0 = arith.constant 0 : index
    %c0_0 = arith.constant 0 : index
    %0 = vector.load %arg1[%c0, %c0_0] : memref<56x128xf32, #tpu.memory_space<vmem>>, vector<16x128xf32>
    %c16 = arith.constant 16 : index
    %c0_1 = arith.constant 0 : index
    %1 = vector.load %arg1[%c16, %c0_1] : memref<56x128xf32, #tpu.memory_space<vmem>>, vector<32x128xf32>
    %c48 = arith.constant 48 : index
    %c0_2 = arith.constant 0 : index
    %2 = vector.load %arg1[%c48, %c0_2] : memref<56x128xf32, #tpu.memory_space<vmem>>, vector<8x128xf32>
    %3 = vector.extract_strided_slice %2 {offsets = [0, 0], sizes = [1, 128], strides = [1, 1]} : vector<8x128xf32> to vector<1x128xf32>
    %4 = vector.extract_strided_slice %2 {offsets = [1, 0], sizes = [1, 32], strides = [1, 1]} : vector<8x128xf32> to vector<1x32xf32>
    %5 = vector.extract_strided_slice %2 {offsets = [2, 0], sizes = [1, 1], strides = [1, 1]} : vector<8x128xf32> to vector<1x1xf32>
    %c0_3 = arith.constant 0 : index
    %c0_4 = arith.constant 0 : index
    %6 = vector.load %arg0[%c0_3, %c0_4] : memref<64x16xf32, #tpu.memory_space<vmem>>, vector<64x16xf32>
    %cst = arith.constant dense<0.000000e+00> : vector<64x128xf32>
    %7 = tpu.matmul %6, %0, %cst {dimension_numbers = #tpu.dot_dimension_numbers<[1], [0], [0], [1], [0, 0, 1, 1], [], []>} : vector<64x16xf32>, vector<16x128xf32>, vector<64x128xf32> -> vector<64x128xf32>
    %8 = vector.broadcast %3 : vector<1x128xf32> to vector<64x128xf32>
    %9 = arith.addf %7, %8 : vector<64x128xf32>
    %cst_5 = arith.constant 0.000000e+00 : f32
    %10 = vector.broadcast %cst_5 : f32 to vector<8x32xf32>
    %cst_6 = arith.constant 0.000000e+00 : f32
    %11 = vector.broadcast %cst_6 : f32 to vector<8x32xf32>
    %12 = vector.extract_strided_slice %9 {offsets = [0, 0], sizes = [8, 128], strides = [1, 1]} : vector<64x128xf32> to vector<8x128xf32>
    %cst_7 = arith.constant dense<0.000000e+00> : vector<8x128xf32>
    %13 = tpu.matmul %10, %1, %cst_7 {dimension_numbers = #tpu.dot_dimension_numbers<[1], [0], [0], [1], [0, 0, 1, 1], [], []>} : vector<8x32xf32>, vector<32x128xf32>, vector<8x128xf32> -> vector<8x128xf32>
    %14 = arith.addf %12, %13 : vector<8x128xf32>
    %15 = math.tanh %14 : vector<8x128xf32>
    %16 = vector.extract_strided_slice %15 {offsets = [0, 0], sizes = [8, 32], strides = [1, 1]} : vector<8x128xf32> to vector<8x32xf32>
    %cst_8 = arith.constant 1.000000e+00 : f32
    %17 = vector.broadcast %cst_8 : f32 to vector<8x32xf32>
    %18 = arith.addf %16, %17 : vector<8x32xf32>
    %cst_9 = arith.constant 5.000000e-01 : f32
    %19 = vector.broadcast %cst_9 : f32 to vector<8x32xf32>
    %20 = arith.mulf %19, %18 : vector<8x32xf32>
    %21 = vector.extract_strided_slice %15 {offsets = [0, 32], sizes = [8, 32], strides = [1, 1]} : vector<8x128xf32> to vector<8x32xf32>
    %cst_10 = arith.constant 1.000000e+00 : f32
    %22 = vector.broadcast %cst_10 : f32 to vector<8x32xf32>
    %23 = arith.addf %21, %22 : vector<8x32xf32>
    %cst_11 = arith.constant 5.000000e-01 : f32
    %24 = vector.broadcast %cst_11 : f32 to vector<8x32xf32>
    %25 = arith.mulf %24, %23 : vector<8x32xf32>
    %26 = vector.extract_strided_slice %15 {offsets = [0, 64], sizes = [8, 32], strides = [1, 1]} : vector<8x128xf32> to vector<8x32xf32>
    %27 = vector.extract_strided_slice %15 {offsets = [0, 96], sizes = [8, 32], strides = [1, 1]} : vector<8x128xf32> to vector<8x32xf32>
    %cst_12 = arith.constant 1.000000e+00 : f32
    %28 = vector.broadcast %cst_12 : f32 to vector<8x32xf32>
    %29 = arith.addf %27, %28 : vector<8x32xf32>
    %cst_13 = arith.constant 5.000000e-01 : f32
    %30 = vector.broadcast %cst_13 : f32 to vector<8x32xf32>
    %31 = arith.mulf %30, %29 : vector<8x32xf32>
    %32 = arith.mulf %25, %11 : vector<8x32xf32>
    %33 = arith.mulf %20, %26 : vector<8x32xf32>
    %34 = arith.addf %32, %33 : vector<8x32xf32>
    %35 = math.tanh %34 : vector<8x32xf32>
    %36 = arith.mulf %31, %35 : vector<8x32xf32>
    %37 = vector.extract_strided_slice %9 {offsets = [8, 0], sizes = [8, 128], strides = [1, 1]} : vector<64x128xf32> to vector<8x128xf32>
    %cst_14 = arith.constant dense<0.000000e+00> : vector<8x128xf32>
    %38 = tpu.matmul %36, %1, %cst_14 {dimension_numbers = #tpu.dot_dimension_numbers<[1], [0], [0], [1], [0, 0, 1, 1], [], []>} : vector<8x32xf32>, vector<32x128xf32>, vector<8x128xf32> -> vector<8x128xf32>
    %39 = arith.addf %37, %38 : vector<8x128xf32>
    %40 = math.tanh %39 : vector<8x128xf32>
    %41 = vector.extract_strided_slice %40 {offsets = [0, 0], sizes = [8, 32], strides = [1, 1]} : vector<8x128xf32> to vector<8x32xf32>
    %cst_15 = arith.constant 1.000000e+00 : f32
    %42 = vector.broadcast %cst_15 : f32 to vector<8x32xf32>
    %43 = arith.addf %41, %42 : vector<8x32xf32>
    %cst_16 = arith.constant 5.000000e-01 : f32
    %44 = vector.broadcast %cst_16 : f32 to vector<8x32xf32>
    %45 = arith.mulf %44, %43 : vector<8x32xf32>
    %46 = vector.extract_strided_slice %40 {offsets = [0, 32], sizes = [8, 32], strides = [1, 1]} : vector<8x128xf32> to vector<8x32xf32>
    %cst_17 = arith.constant 1.000000e+00 : f32
    %47 = vector.broadcast %cst_17 : f32 to vector<8x32xf32>
    %48 = arith.addf %46, %47 : vector<8x32xf32>
    %cst_18 = arith.constant 5.000000e-01 : f32
    %49 = vector.broadcast %cst_18 : f32 to vector<8x32xf32>
    %50 = arith.mulf %49, %48 : vector<8x32xf32>
    %51 = vector.extract_strided_slice %40 {offsets = [0, 64], sizes = [8, 32], strides = [1, 1]} : vector<8x128xf32> to vector<8x32xf32>
    %52 = vector.extract_strided_slice %40 {offsets = [0, 96], sizes = [8, 32], strides = [1, 1]} : vector<8x128xf32> to vector<8x32xf32>
    %cst_19 = arith.constant 1.000000e+00 : f32
    %53 = vector.broadcast %cst_19 : f32 to vector<8x32xf32>
    %54 = arith.addf %52, %53 : vector<8x32xf32>
    %cst_20 = arith.constant 5.000000e-01 : f32
    %55 = vector.broadcast %cst_20 : f32 to vector<8x32xf32>
    %56 = arith.mulf %55, %54 : vector<8x32xf32>
    %57 = arith.mulf %50, %34 : vector<8x32xf32>
    %58 = arith.mulf %45, %51 : vector<8x32xf32>
    %59 = arith.addf %57, %58 : vector<8x32xf32>
    %60 = math.tanh %59 : vector<8x32xf32>
    %61 = arith.mulf %56, %60 : vector<8x32xf32>
    %62 = vector.extract_strided_slice %9 {offsets = [16, 0], sizes = [8, 128], strides = [1, 1]} : vector<64x128xf32> to vector<8x128xf32>
    %cst_21 = arith.constant dense<0.000000e+00> : vector<8x128xf32>
    %63 = tpu.matmul %61, %1, %cst_21 {dimension_numbers = #tpu.dot_dimension_numbers<[1], [0], [0], [1], [0, 0, 1, 1], [], []>} : vector<8x32xf32>, vector<32x128xf32>, vector<8x128xf32> -> vector<8x128xf32>
    %64 = arith.addf %62, %63 : vector<8x128xf32>
    %65 = math.tanh %64 : vector<8x128xf32>
    %66 = vector.extract_strided_slice %65 {offsets = [0, 0], sizes = [8, 32], strides = [1, 1]} : vector<8x128xf32> to vector<8x32xf32>
    %cst_22 = arith.constant 1.000000e+00 : f32
    %67 = vector.broadcast %cst_22 : f32 to vector<8x32xf32>
    %68 = arith.addf %66, %67 : vector<8x32xf32>
    %cst_23 = arith.constant 5.000000e-01 : f32
    %69 = vector.broadcast %cst_23 : f32 to vector<8x32xf32>
    %70 = arith.mulf %69, %68 : vector<8x32xf32>
    %71 = vector.extract_strided_slice %65 {offsets = [0, 32], sizes = [8, 32], strides = [1, 1]} : vector<8x128xf32> to vector<8x32xf32>
    %cst_24 = arith.constant 1.000000e+00 : f32
    %72 = vector.broadcast %cst_24 : f32 to vector<8x32xf32>
    %73 = arith.addf %71, %72 : vector<8x32xf32>
    %cst_25 = arith.constant 5.000000e-01 : f32
    %74 = vector.broadcast %cst_25 : f32 to vector<8x32xf32>
    %75 = arith.mulf %74, %73 : vector<8x32xf32>
    %76 = vector.extract_strided_slice %65 {offsets = [0, 64], sizes = [8, 32], strides = [1, 1]} : vector<8x128xf32> to vector<8x32xf32>
    %77 = vector.extract_strided_slice %65 {offsets = [0, 96], sizes = [8, 32], strides = [1, 1]} : vector<8x128xf32> to vector<8x32xf32>
    %cst_26 = arith.constant 1.000000e+00 : f32
    %78 = vector.broadcast %cst_26 : f32 to vector<8x32xf32>
    %79 = arith.addf %77, %78 : vector<8x32xf32>
    %cst_27 = arith.constant 5.000000e-01 : f32
    %80 = vector.broadcast %cst_27 : f32 to vector<8x32xf32>
    %81 = arith.mulf %80, %79 : vector<8x32xf32>
    %82 = arith.mulf %75, %59 : vector<8x32xf32>
    %83 = arith.mulf %70, %76 : vector<8x32xf32>
    %84 = arith.addf %82, %83 : vector<8x32xf32>
    %85 = math.tanh %84 : vector<8x32xf32>
    %86 = arith.mulf %81, %85 : vector<8x32xf32>
    %87 = vector.extract_strided_slice %9 {offsets = [24, 0], sizes = [8, 128], strides = [1, 1]} : vector<64x128xf32> to vector<8x128xf32>
    %cst_28 = arith.constant dense<0.000000e+00> : vector<8x128xf32>
    %88 = tpu.matmul %86, %1, %cst_28 {dimension_numbers = #tpu.dot_dimension_numbers<[1], [0], [0], [1], [0, 0, 1, 1], [], []>} : vector<8x32xf32>, vector<32x128xf32>, vector<8x128xf32> -> vector<8x128xf32>
    %89 = arith.addf %87, %88 : vector<8x128xf32>
    %90 = math.tanh %89 : vector<8x128xf32>
    %91 = vector.extract_strided_slice %90 {offsets = [0, 0], sizes = [8, 32], strides = [1, 1]} : vector<8x128xf32> to vector<8x32xf32>
    %cst_29 = arith.constant 1.000000e+00 : f32
    %92 = vector.broadcast %cst_29 : f32 to vector<8x32xf32>
    %93 = arith.addf %91, %92 : vector<8x32xf32>
    %cst_30 = arith.constant 5.000000e-01 : f32
    %94 = vector.broadcast %cst_30 : f32 to vector<8x32xf32>
    %95 = arith.mulf %94, %93 : vector<8x32xf32>
    %96 = vector.extract_strided_slice %90 {offsets = [0, 32], sizes = [8, 32], strides = [1, 1]} : vector<8x128xf32> to vector<8x32xf32>
    %cst_31 = arith.constant 1.000000e+00 : f32
    %97 = vector.broadcast %cst_31 : f32 to vector<8x32xf32>
    %98 = arith.addf %96, %97 : vector<8x32xf32>
    %cst_32 = arith.constant 5.000000e-01 : f32
    %99 = vector.broadcast %cst_32 : f32 to vector<8x32xf32>
    %100 = arith.mulf %99, %98 : vector<8x32xf32>
    %101 = vector.extract_strided_slice %90 {offsets = [0, 64], sizes = [8, 32], strides = [1, 1]} : vector<8x128xf32> to vector<8x32xf32>
    %102 = vector.extract_strided_slice %90 {offsets = [0, 96], sizes = [8, 32], strides = [1, 1]} : vector<8x128xf32> to vector<8x32xf32>
    %cst_33 = arith.constant 1.000000e+00 : f32
    %103 = vector.broadcast %cst_33 : f32 to vector<8x32xf32>
    %104 = arith.addf %102, %103 : vector<8x32xf32>
    %cst_34 = arith.constant 5.000000e-01 : f32
    %105 = vector.broadcast %cst_34 : f32 to vector<8x32xf32>
    %106 = arith.mulf %105, %104 : vector<8x32xf32>
    %107 = arith.mulf %100, %84 : vector<8x32xf32>
    %108 = arith.mulf %95, %101 : vector<8x32xf32>
    %109 = arith.addf %107, %108 : vector<8x32xf32>
    %110 = math.tanh %109 : vector<8x32xf32>
    %111 = arith.mulf %106, %110 : vector<8x32xf32>
    %112 = vector.extract_strided_slice %9 {offsets = [32, 0], sizes = [8, 128], strides = [1, 1]} : vector<64x128xf32> to vector<8x128xf32>
    %cst_35 = arith.constant dense<0.000000e+00> : vector<8x128xf32>
    %113 = tpu.matmul %111, %1, %cst_35 {dimension_numbers = #tpu.dot_dimension_numbers<[1], [0], [0], [1], [0, 0, 1, 1], [], []>} : vector<8x32xf32>, vector<32x128xf32>, vector<8x128xf32> -> vector<8x128xf32>
    %114 = arith.addf %112, %113 : vector<8x128xf32>
    %115 = math.tanh %114 : vector<8x128xf32>
    %116 = vector.extract_strided_slice %115 {offsets = [0, 0], sizes = [8, 32], strides = [1, 1]} : vector<8x128xf32> to vector<8x32xf32>
    %cst_36 = arith.constant 1.000000e+00 : f32
    %117 = vector.broadcast %cst_36 : f32 to vector<8x32xf32>
    %118 = arith.addf %116, %117 : vector<8x32xf32>
    %cst_37 = arith.constant 5.000000e-01 : f32
    %119 = vector.broadcast %cst_37 : f32 to vector<8x32xf32>
    %120 = arith.mulf %119, %118 : vector<8x32xf32>
    %121 = vector.extract_strided_slice %115 {offsets = [0, 32], sizes = [8, 32], strides = [1, 1]} : vector<8x128xf32> to vector<8x32xf32>
    %cst_38 = arith.constant 1.000000e+00 : f32
    %122 = vector.broadcast %cst_38 : f32 to vector<8x32xf32>
    %123 = arith.addf %121, %122 : vector<8x32xf32>
    %cst_39 = arith.constant 5.000000e-01 : f32
    %124 = vector.broadcast %cst_39 : f32 to vector<8x32xf32>
    %125 = arith.mulf %124, %123 : vector<8x32xf32>
    %126 = vector.extract_strided_slice %115 {offsets = [0, 64], sizes = [8, 32], strides = [1, 1]} : vector<8x128xf32> to vector<8x32xf32>
    %127 = vector.extract_strided_slice %115 {offsets = [0, 96], sizes = [8, 32], strides = [1, 1]} : vector<8x128xf32> to vector<8x32xf32>
    %cst_40 = arith.constant 1.000000e+00 : f32
    %128 = vector.broadcast %cst_40 : f32 to vector<8x32xf32>
    %129 = arith.addf %127, %128 : vector<8x32xf32>
    %cst_41 = arith.constant 5.000000e-01 : f32
    %130 = vector.broadcast %cst_41 : f32 to vector<8x32xf32>
    %131 = arith.mulf %130, %129 : vector<8x32xf32>
    %132 = arith.mulf %125, %109 : vector<8x32xf32>
    %133 = arith.mulf %120, %126 : vector<8x32xf32>
    %134 = arith.addf %132, %133 : vector<8x32xf32>
    %135 = math.tanh %134 : vector<8x32xf32>
    %136 = arith.mulf %131, %135 : vector<8x32xf32>
    %137 = vector.extract_strided_slice %9 {offsets = [40, 0], sizes = [8, 128], strides = [1, 1]} : vector<64x128xf32> to vector<8x128xf32>
    %cst_42 = arith.constant dense<0.000000e+00> : vector<8x128xf32>
    %138 = tpu.matmul %136, %1, %cst_42 {dimension_numbers = #tpu.dot_dimension_numbers<[1], [0], [0], [1], [0, 0, 1, 1], [], []>} : vector<8x32xf32>, vector<32x128xf32>, vector<8x128xf32> -> vector<8x128xf32>
    %139 = arith.addf %137, %138 : vector<8x128xf32>
    %140 = math.tanh %139 : vector<8x128xf32>
    %141 = vector.extract_strided_slice %140 {offsets = [0, 0], sizes = [8, 32], strides = [1, 1]} : vector<8x128xf32> to vector<8x32xf32>
    %cst_43 = arith.constant 1.000000e+00 : f32
    %142 = vector.broadcast %cst_43 : f32 to vector<8x32xf32>
    %143 = arith.addf %141, %142 : vector<8x32xf32>
    %cst_44 = arith.constant 5.000000e-01 : f32
    %144 = vector.broadcast %cst_44 : f32 to vector<8x32xf32>
    %145 = arith.mulf %144, %143 : vector<8x32xf32>
    %146 = vector.extract_strided_slice %140 {offsets = [0, 32], sizes = [8, 32], strides = [1, 1]} : vector<8x128xf32> to vector<8x32xf32>
    %cst_45 = arith.constant 1.000000e+00 : f32
    %147 = vector.broadcast %cst_45 : f32 to vector<8x32xf32>
    %148 = arith.addf %146, %147 : vector<8x32xf32>
    %cst_46 = arith.constant 5.000000e-01 : f32
    %149 = vector.broadcast %cst_46 : f32 to vector<8x32xf32>
    %150 = arith.mulf %149, %148 : vector<8x32xf32>
    %151 = vector.extract_strided_slice %140 {offsets = [0, 64], sizes = [8, 32], strides = [1, 1]} : vector<8x128xf32> to vector<8x32xf32>
    %152 = vector.extract_strided_slice %140 {offsets = [0, 96], sizes = [8, 32], strides = [1, 1]} : vector<8x128xf32> to vector<8x32xf32>
    %cst_47 = arith.constant 1.000000e+00 : f32
    %153 = vector.broadcast %cst_47 : f32 to vector<8x32xf32>
    %154 = arith.addf %152, %153 : vector<8x32xf32>
    %cst_48 = arith.constant 5.000000e-01 : f32
    %155 = vector.broadcast %cst_48 : f32 to vector<8x32xf32>
    %156 = arith.mulf %155, %154 : vector<8x32xf32>
    %157 = arith.mulf %150, %134 : vector<8x32xf32>
    %158 = arith.mulf %145, %151 : vector<8x32xf32>
    %159 = arith.addf %157, %158 : vector<8x32xf32>
    %160 = math.tanh %159 : vector<8x32xf32>
    %161 = arith.mulf %156, %160 : vector<8x32xf32>
    %162 = vector.extract_strided_slice %9 {offsets = [48, 0], sizes = [8, 128], strides = [1, 1]} : vector<64x128xf32> to vector<8x128xf32>
    %cst_49 = arith.constant dense<0.000000e+00> : vector<8x128xf32>
    %163 = tpu.matmul %161, %1, %cst_49 {dimension_numbers = #tpu.dot_dimension_numbers<[1], [0], [0], [1], [0, 0, 1, 1], [], []>} : vector<8x32xf32>, vector<32x128xf32>, vector<8x128xf32> -> vector<8x128xf32>
    %164 = arith.addf %162, %163 : vector<8x128xf32>
    %165 = math.tanh %164 : vector<8x128xf32>
    %166 = vector.extract_strided_slice %165 {offsets = [0, 0], sizes = [8, 32], strides = [1, 1]} : vector<8x128xf32> to vector<8x32xf32>
    %cst_50 = arith.constant 1.000000e+00 : f32
    %167 = vector.broadcast %cst_50 : f32 to vector<8x32xf32>
    %168 = arith.addf %166, %167 : vector<8x32xf32>
    %cst_51 = arith.constant 5.000000e-01 : f32
    %169 = vector.broadcast %cst_51 : f32 to vector<8x32xf32>
    %170 = arith.mulf %169, %168 : vector<8x32xf32>
    %171 = vector.extract_strided_slice %165 {offsets = [0, 32], sizes = [8, 32], strides = [1, 1]} : vector<8x128xf32> to vector<8x32xf32>
    %cst_52 = arith.constant 1.000000e+00 : f32
    %172 = vector.broadcast %cst_52 : f32 to vector<8x32xf32>
    %173 = arith.addf %171, %172 : vector<8x32xf32>
    %cst_53 = arith.constant 5.000000e-01 : f32
    %174 = vector.broadcast %cst_53 : f32 to vector<8x32xf32>
    %175 = arith.mulf %174, %173 : vector<8x32xf32>
    %176 = vector.extract_strided_slice %165 {offsets = [0, 64], sizes = [8, 32], strides = [1, 1]} : vector<8x128xf32> to vector<8x32xf32>
    %177 = vector.extract_strided_slice %165 {offsets = [0, 96], sizes = [8, 32], strides = [1, 1]} : vector<8x128xf32> to vector<8x32xf32>
    %cst_54 = arith.constant 1.000000e+00 : f32
    %178 = vector.broadcast %cst_54 : f32 to vector<8x32xf32>
    %179 = arith.addf %177, %178 : vector<8x32xf32>
    %cst_55 = arith.constant 5.000000e-01 : f32
    %180 = vector.broadcast %cst_55 : f32 to vector<8x32xf32>
    %181 = arith.mulf %180, %179 : vector<8x32xf32>
    %182 = arith.mulf %175, %159 : vector<8x32xf32>
    %183 = arith.mulf %170, %176 : vector<8x32xf32>
    %184 = arith.addf %182, %183 : vector<8x32xf32>
    %185 = math.tanh %184 : vector<8x32xf32>
    %186 = arith.mulf %181, %185 : vector<8x32xf32>
    %187 = vector.extract_strided_slice %9 {offsets = [56, 0], sizes = [8, 128], strides = [1, 1]} : vector<64x128xf32> to vector<8x128xf32>
    %cst_56 = arith.constant dense<0.000000e+00> : vector<8x128xf32>
    %188 = tpu.matmul %186, %1, %cst_56 {dimension_numbers = #tpu.dot_dimension_numbers<[1], [0], [0], [1], [0, 0, 1, 1], [], []>} : vector<8x32xf32>, vector<32x128xf32>, vector<8x128xf32> -> vector<8x128xf32>
    %189 = arith.addf %187, %188 : vector<8x128xf32>
    %190 = math.tanh %189 : vector<8x128xf32>
    %191 = vector.extract_strided_slice %190 {offsets = [0, 0], sizes = [8, 32], strides = [1, 1]} : vector<8x128xf32> to vector<8x32xf32>
    %cst_57 = arith.constant 1.000000e+00 : f32
    %192 = vector.broadcast %cst_57 : f32 to vector<8x32xf32>
    %193 = arith.addf %191, %192 : vector<8x32xf32>
    %cst_58 = arith.constant 5.000000e-01 : f32
    %194 = vector.broadcast %cst_58 : f32 to vector<8x32xf32>
    %195 = arith.mulf %194, %193 : vector<8x32xf32>
    %196 = vector.extract_strided_slice %190 {offsets = [0, 32], sizes = [8, 32], strides = [1, 1]} : vector<8x128xf32> to vector<8x32xf32>
    %cst_59 = arith.constant 1.000000e+00 : f32
    %197 = vector.broadcast %cst_59 : f32 to vector<8x32xf32>
    %198 = arith.addf %196, %197 : vector<8x32xf32>
    %cst_60 = arith.constant 5.000000e-01 : f32
    %199 = vector.broadcast %cst_60 : f32 to vector<8x32xf32>
    %200 = arith.mulf %199, %198 : vector<8x32xf32>
    %201 = vector.extract_strided_slice %190 {offsets = [0, 64], sizes = [8, 32], strides = [1, 1]} : vector<8x128xf32> to vector<8x32xf32>
    %202 = vector.extract_strided_slice %190 {offsets = [0, 96], sizes = [8, 32], strides = [1, 1]} : vector<8x128xf32> to vector<8x32xf32>
    %cst_61 = arith.constant 1.000000e+00 : f32
    %203 = vector.broadcast %cst_61 : f32 to vector<8x32xf32>
    %204 = arith.addf %202, %203 : vector<8x32xf32>
    %cst_62 = arith.constant 5.000000e-01 : f32
    %205 = vector.broadcast %cst_62 : f32 to vector<8x32xf32>
    %206 = arith.mulf %205, %204 : vector<8x32xf32>
    %207 = arith.mulf %200, %184 : vector<8x32xf32>
    %208 = arith.mulf %195, %201 : vector<8x32xf32>
    %209 = arith.addf %207, %208 : vector<8x32xf32>
    %210 = math.tanh %209 : vector<8x32xf32>
    %211 = arith.mulf %206, %210 : vector<8x32xf32>
    %212 = vector.broadcast %4 : vector<1x32xf32> to vector<8x32xf32>
    %213 = arith.mulf %211, %212 : vector<8x32xf32>
    %cst_63 = arith.constant dense<0.000000e+00> : vector<8xf32>
    %214 = vector.multi_reduction <add>, %213, %cst_63 [1] : vector<8x32xf32> to vector<8xf32>
    %215 = vector.shape_cast %214 : vector<8xf32> to vector<8x1xf32>
    %216 = vector.broadcast %5 : vector<1x1xf32> to vector<8x1xf32>
    %217 = arith.addf %215, %216 : vector<8x1xf32>
    %c0_64 = arith.constant 0 : index
    %c0_65 = arith.constant 0 : index
    %218 = vector.load %arg2[%c0_64, %c0_65] : memref<8x1xf32, #tpu.memory_space<vmem>>, vector<8x1xf32>
    tpu.vector_store %arg2[%c0_64, %c0_65], %217 {strides = array<i32>} : memref<8x1xf32, #tpu.memory_space<vmem>>, vector<8x1xf32>,
    return
  }
}

</mosaic_0001>

<bundles_post_ra>
// kernel: tpu_custom_call.1
= control target key start
LH: loop header
LB: loop body
LE: loop exit
PB: predicated region body
PF: predicated region fallthrough
CT: control target
= control target key end

     0   :  { %v1160_v0 = vmov 0.0   ;;  %vm1161_vm0 = vmmov 0   ;;  %vm30_vm1 = vcmask 130048   ;;  %v26_v9 = vlaneseq  ;;  %s1162_s27 = smov 64   ;;  %s1397_s1 = inlined_call_operand.vmem [shape: f32[56,128], index: 1, kind: input, shape index: {}]   ;;  %s1398_s0 = inlined_call_operand.vmem [shape: f32[64,16], index: 0, kind: input, shape index: {}]   ;;  %s1399_s2 = inlined_call_operand.vmem [shape: f32[8,1], index: 2, kind: output, shape index: {}]  }
   0x1   :  { %1035 = vmatprep.subr.mxu1 %v1160_v0  ;;  %v12_v1 = vld [vmem:[%s1397_s1 + $0x8] sm:$0xff]  ;;  %1043 = vmatprep.mubr.msk.f32.mxu1 %vm1161_vm0, %v1160_v0  ;;  %v11_v3 = vld [vmem:[%s1397_s1] sm:$0xff]  ;;  %v1211_v7 = vld [vmem:[%s1397_s1 + $0x18] sm:$0xff]  ;;  %vm160_vm2 = vcmask 261120   ;;  %vm948_vm3 = vcmask 7168  }
   0x2   :  { %v1187_v2 = vld [vmem:[%s1397_s1 + $0x28] sm:$0xff]  ;;  %1019 = vmatprep.subr.mxu0 %v12_v1  ;;  %v1198_v4 = vld [vmem:[%s1397_s1 + $0x20] sm:$0xff]  ;;  %v1219_v8 = vld [vmem:[%s1397_s1 + $0x10] sm:$0xff]  ;;  %v1245_v10 = vshrl.u32 %v26_v9, 7 }
   0x3   :  { %1036 = vmatpush3.msra.mxu1 %v1187_v2  ;;  %v18_v5 = vld [vmem:[%s1398_s0] sm:$0xff]  ;;  %1020 = vmatpush3.msra.mxu0 %v12_v1  ;;  %v19_v6 = vld [vmem:[%s1398_s0 + $0x8] sm:$0xff]  ;;  %v1251_v12 = vld [vmem:[%s1397_s1 + $0x30] sm:$0xff]  ;;  %s1163_s1 = smov 32  }
   0x4   :  { %1037 = vmatprep.subr.mxu1 %v1160_v0  ;;  %1021 = vmatprep.subr.mxu0 %v11_v3  ;;  %v28_v11 = vsub.s32 0, %v1245_v10  ;;  %v20_v44 = vld [vmem:[%s1398_s0 + $0x10] sm:$0xff]  ;;  %v21_v45 = vld [vmem:[%s1398_s0 + $0x18] sm:$0xff]  ;;  %v22_v46 = vld [vmem:[%s1398_s0 + $0x20] sm:$0xff] }
   0x5   :  { %1038 = vmatpush3.msra.mxu1 %v1198_v4  ;;  %1022 = vmatpush3.msra.mxu0 %v11_v3  ;;  %v23_v47 = vld [vmem:[%s1398_s0 + $0x28] sm:$0xff]  ;;  %v24_v48 = vld [vmem:[%s1398_s0 + $0x30] sm:$0xff]  ;;  %v25_v49 = vld [vmem:[%s1398_s0 + $0x38] sm:$0xff]  ;;  %s1164_s0 = smov 96  }
   0x6   :  { %1023 = vmatprep.mubr.msk.f32.mxu0 %vm30_vm1, %v18_v5  ;;  %1039 = vmatprep.subr.mxu1 %v1160_v0  ;;  %v1254_v14 = vrot.slane %v1251_v12, %v28_v11 }
   0x7   :  { %1024 = vmatmul.mubr.msk.f32.vlgmr.msra.gmra.mxu0 %vm30_vm1, %v19_v6  ;;  %1040 = vmatpush3.msra.mxu1 %v1211_v7 }
   0x8   :  { %1057 = vmatprep.subr.mxu0 %v1160_v0  ;;  %1041 = vmatprep.subr.mxu1 %v1160_v0 }
   0x9   :  { %1058 = vmatpush3.msra.mxu0 %v1187_v2  ;;  %1042 = vmatpush3.msra.mxu1 %v1219_v8 }
   0xa   :  { %1059 = vmatprep.subr.mxu0 %v1160_v0  ;;  %1044 = vmatmul.mubr.f32.vlgmr.msra.gmra.mxu1 %v1160_v0 }
   0xb   :  { %1046 = vmatprep.subr.mxu1 %v1160_v0  ;;  %1054 = vmatprep.mubr.msk.f32.mxu1 %vm1161_vm0, %v1160_v0 }
   0xc   :  { %1047 = vmatpush3.msra.mxu1 %v1187_v2  ;;  %1060 = vmatpush3.msra.mxu0 %v1198_v4 }
   0xd   :  { %1048 = vmatprep.subr.mxu1 %v1160_v0  ;;  %1061 = vmatprep.subr.mxu0 %v1160_v0 }
   0xe   :  { %1049 = vmatpush3.msra.mxu1 %v1198_v4  ;;  %1062 = vmatpush3.msra.mxu0 %v1211_v7 }
   0xf   :  { %1050 = vmatprep.subr.mxu1 %v1160_v0  ;;  %1063 = vmatprep.subr.mxu0 %v1160_v0 }
  0x10   :  { %1051 = vmatpush3.msra.mxu1 %v1211_v7  ;;  %1064 = vmatpush3.msra.mxu0 %v1219_v8 }
  0x11   :  { %1052 = vmatprep.subr.mxu1 %v1160_v0  ;;  %1079 = vmatprep.subr.mxu0 %v1160_v0 }
  0x12   :  { %1053 = vmatpush3.msra.mxu1 %v1219_v8  ;;  %1026 = vmatprep.mubr.msk.f32.mxu0 %vm30_vm1, %v20_v44 }
  0x13   :  { %1068 = vmatprep.subr.mxu1 %v1160_v0  ;;  %1027 = vmatmul.mubr.msk.f32.gmra.mxu0 %vm30_vm1, %v21_v45 }
  0x14   :  { %1029 = vmatprep.mubr.msk.f32.mxu0 %vm30_vm1, %v22_v46 }
  0x17   :  { %1030 = vmatmul.mubr.msk.f32.gmra.mxu0 %vm30_vm1, %v23_v47 }
  0x18   :  { %1032 = vmatprep.mubr.msk.f32.mxu0 %vm30_vm1, %v24_v48 }
  0x1b   :  { %1033 = vmatmul.mubr.msk.f32.gmra.mxu0 %vm30_vm1, %v25_v49 }
  0x1c   :  { %1065 = vmatprep.mubr.msk.f32.mxu0 %vm1161_vm0, %v1160_v0 }
  0xc7   :  { %v1025_v13 = vpop.f32.mrf.mxu0 }
  0xc8   :  { %v127_v32 = vadd.f32 %v1025_v13, %v1254_v14 }
  0xc9   :  { %v121_v15 = vpop.f32.mrf.mxu0 }
  0xca   :  { %v122_v16 = vadd.f32 %v121_v15, %v1254_v14  ;;  %v230_v17 = vpop.f32.mrf.mxu1 }
  0xcc   :  { %v234_v18 = vadd.f32 %v230_v17, %v122_v16  ;;  %v1045_v19 = vpop.f32.mrf.mxu1 }
  0xce   :  { %1128 = vtanh.f32 %v234_v18 }
  0xd3   :  { %v1028_v54 = vpop.f32.mrf.mxu0 }
  0xd5   :  { %v131_v55 = vpop.f32.mrf.mxu0 }
  0xd6   :  { %v132_v60 = vadd.f32 %v131_v55, %v1254_v14 }
  0xd7   :  { %v1314_v56 = vpop.f32.mrf.mxu0 }
  0xd9   :  { %v1316_v57 = vpop.f32.mrf.mxu0 }
  0xdb   :  { %v1129_v20 = vpop.eup %1128  ;;  %v1318_v58 = vpop.f32.mrf.mxu0 }
  0xdc   :  { %240 = vrot.lane.b32.xlu0 %v1129_v20, %s1162_s27  ;;  %v236_v21 = vadd.f32 1.0, %v1129_v20  ;;  %v137_v20 = vadd.f32 %v1028_v54, %v1254_v14 }
  0xdd   :  { %v1320_v59 = vpop.f32.mrf.mxu0 }
  0xde   :  { %v237_v22 = vmul.f32 0.5, %v236_v21 }
  0xe0   :  { %v238_v25 = vmul.f32 0.0, %v237_v22 }
 0x14e   :  { %v241_v23 = vpop.permute.xlu0 %240 }
 0x14f   :  { %v243_v24 = vmul.f32 %v241_v23, %v237_v22 }
 0x151   :  { %245 = vrot.lane.b32.xlu0 %v243_v24, %s1163_s1 }
 0x1c3   :  { %v246_v26 = vpop.permute.xlu0 %245 }
 0x1c4   :  { %v248_v27 = vadd.f32 %v246_v26, %v238_v25 }
 0x1c6   :  { %1130 = vtanh.f32 %v248_v27 }
 0x1d3   :  { %v1131_v28 = vpop.eup %1130 }
 0x1d4   :  { %251 = vrot.lane.b32.xlu1 %v1131_v28, %s1162_s27 }
 0x246   :  { %v252_v29 = vpop.permute.xlu1 %251 }
 0x247   :  { %v254_v30 = vmul.f32 %v252_v29, %v237_v22 }
 0x249   :  { %256 = vrot.lane.b32.xlu1 %v254_v30, %s1163_s1 }
 0x2bb   :  { %v257_v31 = vpop.permute.xlu1 %256 }
 0x2bc   :  { %1055 = vmatmul.mubr.msk.f32.vlgmr.msra.gmra.mxu1 %vm160_vm2, %v257_v31 }
 0x2bd   :  { %1069 = vmatpush3.msra.mxu1 %v1187_v2  ;;  %1076 = vmatprep.mubr.msk.f32.mxu1 %vm1161_vm0, %v1160_v0 }
 0x2be   :  { %1070 = vmatprep.subr.mxu1 %v1160_v0 }
 0x2bf   :  { %1071 = vmatpush3.msra.mxu1 %v1198_v4 }
 0x2c0   :  { %1072 = vmatprep.subr.mxu1 %v1160_v0 }
 0x2c1   :  { %1073 = vmatpush3.msra.mxu1 %v1211_v7 }
 0x2c2   :  { %1074 = vmatprep.subr.mxu1 %v1160_v0 }
 0x2c3   :  { %1075 = vmatpush3.msra.mxu1 %v1219_v8 }
 0x2c4   :  { %1090 = vmatprep.subr.mxu1 %v1160_v0 }
 0x37c   :  { %v326_v33 = vpop.f32.mrf.mxu1 }
 0x37d   :  { %v330_v34 = vadd.f32 %v326_v33, %v127_v32 }
 0x37e   :  { %v1056_v35 = vpop.f32.mrf.mxu1 }
 0x37f   :  { %1132 = vtanh.f32 %v330_v34 }
 0x38c   :  { %v1133_v36 = vpop.eup %1132 }
 0x38d   :  { %336 = vrot.lane.b32.xlu0 %v1133_v36, %s1162_s27  ;;  %v332_v37 = vadd.f32 1.0, %v1133_v36  ;;  %v142_v36 = vadd.f32 %v1316_v57, %v1254_v14 }
 0x38f   :  { %v333_v38 = vmul.f32 0.5, %v332_v37 }
 0x391   :  { %v334_v41 = vmul.f32 %v333_v38, %v248_v27 }
 0x3ff   :  { %v337_v39 = vpop.permute.xlu0 %336 }
 0x400   :  { %v339_v40 = vmul.f32 %v337_v39, %v333_v38 }
 0x402   :  { %341 = vrot.lane.b32.xlu1 %v339_v40, %s1163_s1 }
 0x474   :  { %v342_v42 = vpop.permute.xlu1 %341 }
 0x475   :  { %v344_v43 = vadd.f32 %v342_v42, %v334_v41 }
 0x477   :  { %1134 = vtanh.f32 %v344_v43 }
 0x484   :  { %v1135_v50 = vpop.eup %1134 }
 0x485   :  { %347 = vrot.lane.b32.xlu0 %v1135_v50, %s1162_s27 }
 0x4f7   :  { %v348_v51 = vpop.permute.xlu0 %347 }
 0x4f8   :  { %v350_v52 = vmul.f32 %v348_v51, %v333_v38 }
 0x4fa   :  { %352 = vrot.lane.b32.xlu1 %v350_v52, %s1163_s1  ;;  %v147_v52 = vadd.f32 %v1314_v56, %v1254_v14 }
 0x56c   :  { %v353_v53 = vpop.permute.xlu1 %352 }
 0x56d   :  { %1066 = vmatmul.mubr.msk.f32.vlgmr.msra.gmra.mxu0 %vm160_vm2, %v353_v53 }
 0x56e   :  { %1080 = vmatpush3.msra.mxu0 %v1187_v2  ;;  %1087 = vmatprep.mubr.msk.f32.mxu0 %vm1161_vm0, %v1160_v0 }
 0x56f   :  { %1081 = vmatprep.subr.mxu0 %v1160_v0 }
 0x570   :  { %1082 = vmatpush3.msra.mxu0 %v1198_v4 }
 0x571   :  { %1083 = vmatprep.subr.mxu0 %v1160_v0 }
 0x572   :  { %1084 = vmatpush3.msra.mxu0 %v1211_v7 }
 0x573   :  { %1085 = vmatprep.subr.mxu0 %v1160_v0 }
 0x574   :  { %1086 = vmatpush3.msra.mxu0 %v1219_v8 }
 0x575   :  { %1101 = vmatprep.subr.mxu0 %v1160_v0 }
 0x62d   :  { %v422_v61 = vpop.f32.mrf.mxu0 }
 0x62e   :  { %v426_v62 = vadd.f32 %v422_v61, %v132_v60 }
 0x62f   :  { %v1067_v63 = vpop.f32.mrf.mxu0 }
 0x630   :  { %1136 = vtanh.f32 %v426_v62 }
 0x63d   :  { %v1137_v1 = vpop.eup %1136 }
 0x63e   :  { %432 = vrot.lane.b32.xlu0 %v1137_v1, %s1162_s27  ;;  %v428_v3 = vadd.f32 1.0, %v1137_v1 }
 0x640   :  { %v429_v5 = vmul.f32 0.5, %v428_v3  ;;  %v152_v3 = vadd.f32 %v1320_v59, %v1254_v14 }
 0x642   :  { %v430_v11 = vmul.f32 %v429_v5, %v344_v43 }
 0x6b0   :  { %v433_v6 = vpop.permute.xlu0 %432 }
 0x6b1   :  { %v435_v9 = vmul.f32 %v433_v6, %v429_v5 }
 0x6b3   :  { %437 = vrot.lane.b32.xlu1 %v435_v9, %s1163_s1 }
 0x725   :  { %v438_v13 = vpop.permute.xlu1 %437 }
 0x726   :  { %v440_v15 = vadd.f32 %v438_v13, %v430_v11 }
 0x728   :  { %1138 = vtanh.f32 %v440_v15 }
 0x735   :  { %v1139_v16 = vpop.eup %1138 }
 0x736   :  { %443 = vrot.lane.b32.xlu0 %v1139_v16, %s1162_s27 }
 0x7a8   :  { %v444_v17 = vpop.permute.xlu0 %443 }
 0x7a9   :  { %v446_v18 = vmul.f32 %v444_v17, %v429_v5 }
 0x7ab   :  { %448 = vrot.lane.b32.xlu1 %v446_v18, %s1163_s1 }
 0x81d   :  { %v449_v19 = vpop.permute.xlu1 %448 }
 0x81e   :  { %1077 = vmatmul.mubr.msk.f32.vlgmr.msra.gmra.mxu1 %vm160_vm2, %v449_v19 }
 0x81f   :  { %1091 = vmatpush3.msra.mxu1 %v1187_v2  ;;  %1098 = vmatprep.mubr.msk.f32.mxu1 %vm1161_vm0, %v1160_v0 }
 0x820   :  { %1092 = vmatprep.subr.mxu1 %v1160_v0 }
 0x821   :  { %1093 = vmatpush3.msra.mxu1 %v1198_v4 }
 0x822   :  { %1094 = vmatprep.subr.mxu1 %v1160_v0 }
 0x823   :  { %1095 = vmatpush3.msra.mxu1 %v1211_v7 }
 0x824   :  { %1096 = vmatprep.subr.mxu1 %v1160_v0 }
 0x825   :  { %1097 = vmatpush3.msra.mxu1 %v1219_v8 }
 0x826   :  { %1112 = vmatprep.subr.mxu1 %v1160_v0 }
 0x8de   :  { %v518_v21 = vpop.f32.mrf.mxu1 }
 0x8df   :  { %v522_v22 = vadd.f32 %v518_v21, %v137_v20 }
 0x8e0   :  { %v1078_v23 = vpop.f32.mrf.mxu1 }
 0x8e1   :  { %1140 = vtanh.f32 %v522_v22 }
 0x8ee   :  { %v1141_v24 = vpop.eup %1140 }
 0x8ef   :  { %528 = vrot.lane.b32.xlu0 %v1141_v24, %s1162_s27  ;;  %v524_v25 = vadd.f32 1.0, %v1141_v24  ;;  %v157_v24 = vadd.f32 %v1318_v58, %v1254_v14 }
 0x8f1   :  { %v525_v26 = vmul.f32 0.5, %v524_v25 }
 0x8f3   :  { %v526_v29 = vmul.f32 %v525_v26, %v440_v15 }
 0x961   :  { %v529_v27 = vpop.permute.xlu0 %528 }
 0x962   :  { %v531_v28 = vmul.f32 %v529_v27, %v525_v26 }
 0x964   :  { %533 = vrot.lane.b32.xlu1 %v531_v28, %s1163_s1 }
 0x9d6   :  { %v534_v30 = vpop.permute.xlu1 %533 }
 0x9d7   :  { %v536_v31 = vadd.f32 %v534_v30, %v526_v29 }
 0x9d9   :  { %1142 = vtanh.f32 %v536_v31 }
 0x9e6   :  { %v1143_v32 = vpop.eup %1142 }
 0x9e7   :  { %539 = vrot.lane.b32.xlu0 %v1143_v32, %s1162_s27 }
 0xa59   :  { %v540_v33 = vpop.permute.xlu0 %539 }
 0xa5a   :  { %v542_v34 = vmul.f32 %v540_v33, %v525_v26  ;;  %v929_v33 = vsub.s32 1, %v1245_v10 }
 0xa5c   :  { %544 = vrot.lane.b32.xlu1 %v542_v34, %s1163_s1  ;;  %v930_v34 = vrot.slane %v1251_v12, %v929_v33 }
 0xace   :  { %v545_v35 = vpop.permute.xlu1 %544 }
 0xacf   :  { %1088 = vmatmul.mubr.msk.f32.vlgmr.msra.gmra.mxu0 %vm160_vm2, %v545_v35 }
 0xad0   :  { %1102 = vmatpush3.msra.mxu0 %v1187_v2  ;;  %1109 = vmatprep.mubr.msk.f32.mxu0 %vm1161_vm0, %v1160_v0 }
 0xad1   :  { %1103 = vmatprep.subr.mxu0 %v1160_v0 }
 0xad2   :  { %1104 = vmatpush3.msra.mxu0 %v1198_v4 }
 0xad3   :  { %1105 = vmatprep.subr.mxu0 %v1160_v0 }
 0xad4   :  { %1106 = vmatpush3.msra.mxu0 %v1211_v7 }
 0xad5   :  { %1107 = vmatprep.subr.mxu0 %v1160_v0 }
 0xad6   :  { %1108 = vmatpush3.msra.mxu0 %v1219_v8 }
 0xb8f   :  { %v614_v37 = vpop.f32.mrf.mxu0 }
 0xb90   :  { %v618_v38 = vadd.f32 %v614_v37, %v142_v36 }
 0xb91   :  { %v1089_v39 = vpop.f32.mrf.mxu0 }
 0xb92   :  { %1144 = vtanh.f32 %v618_v38 }
 0xb9f   :  { %v1145_v40 = vpop.eup %1144 }
 0xba0   :  { %624 = vrot.lane.b32.xlu0 %v1145_v40, %s1162_s27  ;;  %v620_v41 = vadd.f32 1.0, %v1145_v40 }
 0xba2   :  { %v621_v42 = vmul.f32 0.5, %v620_v41 }
 0xba4   :  { %v622_v45 = vmul.f32 %v621_v42, %v536_v31 }
 0xc12   :  { %v625_v43 = vpop.permute.xlu0 %624 }
 0xc13   :  { %v627_v44 = vmul.f32 %v625_v43, %v621_v42  ;;  %v945_v43 = vsub.s32 2, %v1245_v10 }
 0xc15   :  { %629 = vrot.lane.b32.xlu1 %v627_v44, %s1163_s1  ;;  %v946_v44 = vrot.slane %v1251_v12, %v945_v43 }
 0xc87   :  { %v630_v46 = vpop.permute.xlu1 %629 }
 0xc88   :  { %v632_v47 = vadd.f32 %v630_v46, %v622_v45 }
 0xc8a   :  { %1146 = vtanh.f32 %v632_v47 }
 0xc97   :  { %v1147_v48 = vpop.eup %1146 }
 0xc98   :  { %635 = vrot.lane.b32.xlu0 %v1147_v48, %s1162_s27 }
 0xd0a   :  { %v636_v49 = vpop.permute.xlu0 %635 }
 0xd0b   :  { %v638_v50 = vmul.f32 %v636_v49, %v621_v42 }
 0xd0d   :  { %640 = vrot.lane.b32.xlu1 %v638_v50, %s1163_s1 }
 0xd7f   :  { %v641_v51 = vpop.permute.xlu1 %640 }
 0xd80   :  { %1099 = vmatmul.mubr.msk.f32.vlgmr.msra.gmra.mxu1 %vm160_vm2, %v641_v51 }
 0xd81   :  { %1113 = vmatpush3.msra.mxu1 %v1187_v2  ;;  %1120 = vmatprep.mubr.msk.f32.mxu1 %vm1161_vm0, %v1160_v0 }
 0xd82   :  { %1114 = vmatprep.subr.mxu1 %v1160_v0 }
 0xd83   :  { %1115 = vmatpush3.msra.mxu1 %v1198_v4 }
 0xd84   :  { %1116 = vmatprep.subr.mxu1 %v1160_v0 }
 0xd85   :  { %1117 = vmatpush3.msra.mxu1 %v1211_v7 }
 0xd86   :  { %1118 = vmatprep.subr.mxu1 %v1160_v0 }
 0xd87   :  { %1119 = vmatpush3.msra.mxu1 %v1219_v8 }
 0xe40   :  { %v710_v53 = vpop.f32.mrf.mxu1 }
 0xe41   :  { %v714_v2 = vadd.f32 %v710_v53, %v147_v52 }
 0xe42   :  { %v1100_v54 = vpop.f32.mrf.mxu1 }
 0xe43   :  { %1148 = vtanh.f32 %v714_v2 }
 0xe50   :  { %v1149_v55 = vpop.eup %1148 }
 0xe51   :  { %720 = vrot.lane.b32.xlu0 %v1149_v55, %s1162_s27  ;;  %v716_v57 = vadd.f32 1.0, %v1149_v55 }
 0xe53   :  { %v717_v4 = vmul.f32 0.5, %v716_v57 }
 0xe55   :  { %v718_v7 = vmul.f32 %v717_v4, %v632_v47 }
 0xec3   :  { %v721_v60 = vpop.permute.xlu0 %720 }
 0xec4   :  { %v723_v61 = vmul.f32 %v721_v60, %v717_v4 }
 0xec6   :  { %725 = vrot.lane.b32.xlu1 %v723_v61, %s1163_s1 }
 0xf38   :  { %v726_v0 = vpop.permute.xlu1 %725 }
 0xf39   :  { %v728_v62 = vadd.f32 %v726_v0, %v718_v7 }
 0xf3b   :  { %1150 = vtanh.f32 %v728_v62 }
 0xf48   :  { %v1151_v8 = vpop.eup %1150 }
 0xf49   :  { %731 = vrot.lane.b32.xlu0 %v1151_v8, %s1162_s27 }
 0xfbb   :  { %v732_v56 = vpop.permute.xlu0 %731 }
 0xfbc   :  { %v734_v63 = vmul.f32 %v732_v56, %v717_v4 }
 0xfbe   :  { %736 = vrot.lane.b32.xlu1 %v734_v63, %s1163_s1 }
0x1030   :  { %v737_v1 = vpop.permute.xlu1 %736 }
0x1031   :  { %1110 = vmatmul.mubr.msk.f32.vlgmr.msra.gmra.mxu0 %vm160_vm2, %v737_v1 }
0x10f1   :  { %v806_v5 = vpop.f32.mrf.mxu0 }
0x10f2   :  { %v810_v6 = vadd.f32 %v806_v5, %v152_v3 }
0x10f3   :  { %v1111_v9 = vpop.f32.mrf.mxu0 }
0x10f4   :  { %1152 = vtanh.f32 %v810_v6 }
0x1101   :  { %v1153_v11 = vpop.eup %1152 }
0x1102   :  { %816 = vrot.lane.b32.xlu0 %v1153_v11, %s1162_s27  ;;  %v812_v13 = vadd.f32 1.0, %v1153_v11 }
0x1104   :  { %v813_v15 = vmul.f32 0.5, %v812_v13 }
0x1106   :  { %v814_v18 = vmul.f32 %v813_v15, %v728_v62 }
0x1174   :  { %v817_v16 = vpop.permute.xlu0 %816 }
0x1175   :  { %v819_v17 = vmul.f32 %v817_v16, %v813_v15 }
0x1177   :  { %821 = vrot.lane.b32.xlu1 %v819_v17, %s1163_s1 }
0x11e9   :  { %v822_v19 = vpop.permute.xlu1 %821 }
0x11ea   :  { %v824_v20 = vadd.f32 %v822_v19, %v814_v18 }
0x11ec   :  { %1154 = vtanh.f32 %v824_v20 }
0x11f9   :  { %v1155_v21 = vpop.eup %1154 }
0x11fa   :  { %827 = vrot.lane.b32.xlu0 %v1155_v21, %s1162_s27 }
0x126c   :  { %v828_v59 = vpop.permute.xlu0 %827 }
0x126d   :  { %v830_v22 = vmul.f32 %v828_v59, %v813_v15 }
0x126f   :  { %832 = vrot.lane.b32.xlu1 %v830_v22, %s1163_s1 }
0x12e1   :  { %v833_v23 = vpop.permute.xlu1 %832 }
0x12e2   :  { %1121 = vmatmul.mubr.msk.f32.vlgmr.msra.gmra.mxu1 %vm160_vm2, %v833_v23 }
0x13a2   :  { %v902_v25 = vpop.f32.mrf.mxu1 }
0x13a3   :  { %v906_v26 = vadd.f32 %v902_v25, %v157_v24 }
0x13a4   :  { %v1122_v27 = vpop.f32.mrf.mxu1 }
0x13a5   :  { %1156 = vtanh.f32 %v906_v26 }
0x13b2   :  { %v1157_v28 = vpop.eup %1156 }
0x13b3   :  { %912 = vrot.lane.b32.xlu0 %v1157_v28, %s1162_s27  ;;  %v908_v29 = vadd.f32 1.0, %v1157_v28 }
0x13b5   :  { %v909_v30 = vmul.f32 0.5, %v908_v29 }
0x13b7   :  { %v910_v14 = vmul.f32 %v909_v30, %v824_v20 }
0x1425   :  { %v913_v31 = vpop.permute.xlu0 %912 }
0x1426   :  { %v915_v32 = vmul.f32 %v913_v31, %v909_v30 }
0x1428   :  { %917 = vrot.lane.b32.xlu1 %v915_v32, %s1163_s1 }
0x142c   :  { %932 = vrot.lane.b32.xlu1 %v930_v34, %s1164_s0 }
0x149a   :  { %v918_v58 = vpop.permute.xlu1 %917 }
0x149b   :  { %v920_v35 = vadd.f32 %v918_v58, %v910_v14 }
0x149d   :  { %1158 = vtanh.f32 %v920_v35 }
0x149e   :  { %v933_v38 = vpop.permute.xlu1 %932 }
0x14aa   :  { %v1159_v36 = vpop.eup %1158 }
0x14ab   :  { %923 = vrot.lane.b32.xlu0 %v1159_v36, %s1162_s27 }
0x151d   :  { %v924_v37 = vpop.permute.xlu0 %923 }
0x151e   :  { %v926_v39 = vmul.f32 %v924_v37, %v909_v30 }
0x1520   :  { %v935_v40 = vmul.f32 %v933_v38, %v926_v39 }
0x1522   :  { %937 = vrot.lane.b32.xlu0 %v935_v40, %s1163_s1 }
0x1594   :  { %v938_v41 = vpop.permute.xlu0 %937 }
0x1595   :  { %v940_v42 = vsel %vm160_vm2, %v938_v41, 0.0 }
0x1596   :  { %941 = vadd.xlane.f32.xlu1 %v940_v42 }
0x161f   :  { %v942_v45 = vpop.xlane.xlu1 %941 }
0x1620   :  { %v947_v46 = vadd.f32 %v946_v44, %v942_v45 }
0x1622   :  { %949 = vst.msk [vmem:[%s1399_s2] sm:$0xff] %vm948_vm3, %v947_v46 }

</bundles_post_ra>
